<compile_context>
chip_gen: v6e
topology: v6e:2x2x1
jax: 0.10.0
libtpu: 0.0.40
codegen_flags: <defaults>
</compile_context>

<pallas_src>
import math

import jax
import jax.numpy as jnp
from jax.experimental import pallas as pl
from jax.experimental.pallas import tpu as pltpu


def _layer_scale_kernel(x_ref, gamma_ref, o_ref):
    # (tm, D_eff) * (1, D_eff) broadcast multiply on the VPU.
    o_ref[...] = x_ref[...] * gamma_ref[...]


def layer_scale(x: jax.Array, gamma: jax.Array) -> jax.Array:
    """Applies y = x * gamma where gamma has shape (D,) and x has shape (..., D)."""
    orig_shape = x.shape
    D = orig_shape[-1]
    assert gamma.shape == (D,), f"gamma must have shape ({D},), got {gamma.shape}"

    gamma = gamma.astype(x.dtype)
    x2 = x.reshape(-1, D)
    M = x2.shape[0]

    # --- Lane-dense repack ---------------------------------------------------
    # If D is not a multiple of 128, output stores lower to masked partial
    # stores. Fold groups of r rows into the lane axis so the last dim becomes
    # a multiple of 128, and tile gamma to match the folded layout.
    M_eff, D_eff = M, D
    gamma2 = gamma.reshape(1, D)
    if D % 128 != 0:
        r = 128 // math.gcd(D, 128)  # smallest fold s.t. (r * D) % 128 == 0
        if M % r == 0:
            M_eff, D_eff = M // r, r * D
            x2 = x2.reshape(M_eff, D_eff)
            gamma2 = jnp.tile(gamma, r).reshape(1, D_eff)
        # else: fall back to masked stores (still correct, only hit for
        # non-128-multiple hidden dims with awkward row counts).

    # --- Dtype-aware, VMEM-budgeted row tile ----------------------------------
    itemsize = jnp.dtype(x.dtype).itemsize
    sublane = {4: 8, 2: 16, 1: 32}.get(itemsize, 8)

    # ~4 MiB per x/out tile -> ~16 MiB double-buffered working set.
    tile_budget_bytes = 4 * 1024 * 1024
    rows_fit = max(sublane, tile_budget_bytes // max(1, D_eff * itemsize))
    tm = min(1024, rows_fit)                         # diminishing returns past ~1024 rows
    tm = max(sublane, (tm // sublane) * sublane)     # keep sublane packing unmasked

    if M_eff <= tm:
        tm = M_eff  # single block equal to the full dim (always a legal block)
    grid = (pl.cdiv(M_eff, tm),)  # ragged last block handled by Pallas masking

    cost = pl.CostEstimate(
        flops=M_eff * D_eff,
        transcendentals=0,
        bytes_accessed=(2 * M_eff * D_eff + D_eff) * itemsize,
    )

    # TODO(synk): the PyTorch `inplace=True` path (x.mul_) has no aliasing
    # equivalent for immutable JAX arrays; out-of-place result is identical.
    out2 = pl.pallas_call(
        _layer_scale_kernel,
        out_shape=jax.ShapeDtypeStruct((M_eff, D_eff), x.dtype),
        grid_spec=pltpu.PrefetchScalarGridSpec(
            num_scalar_prefetch=0,
            grid=grid,
            in_specs=[
                pl.BlockSpec((tm, D_eff), lambda i: (i, 0)),  # streamed x tiles
                pl.BlockSpec((1, D_eff), lambda i: (0, 0)),   # VMEM-resident gamma
            ],
            out_specs=pl.BlockSpec((tm, D_eff), lambda i: (i, 0)),
        ),
        compiler_params=pltpu.CompilerParams(
            dimension_semantics=("parallel",),   # megacore split on v7x
            vmem_limit_bytes=32 * 1024 * 1024,   # raise v5e's 16 MiB default; safe on all chips
        ),
        cost_estimate=cost,
    )(x2, gamma2)

    return out2.reshape(orig_shape)


if __name__ == "__main__":
    key = jax.random.PRNGKey(0)
    init_values = 1e-5  # LayerScale default

    # Small ViT-block-like input (batch, tokens, hidden). D=32 exercises the
    # lane-dense repack path (rows folded so the last dim becomes 128).
    B, N, D = 2, 8, 32
    x = jax.random.normal(key, (B, N, D), dtype=jnp.float32)
    gamma = init_values * jnp.ones((D,), dtype=jnp.float32)

    y = layer_scale(x, gamma)
    jax.block_until_ready(y)
    assert y.shape == x.shape
    assert jnp.allclose(y, x * gamma, atol=1e-7, rtol=1e-6)

    # bf16, lane-dense D (multiple of 128) path with dtype-aware sublane tiling.
    B2, N2, D2 = 2, 16, 256
    x_bf16 = jax.random.normal(jax.random.PRNGKey(1), (B2, N2, D2), dtype=jnp.bfloat16)
    gamma_bf16 = (init_values * jnp.ones((D2,), dtype=jnp.float32)).astype(jnp.bfloat16)
    y_bf16 = layer_scale(x_bf16, gamma_bf16)
    jax.block_until_ready(y_bf16)
    ref_bf16 = (x_bf16.astype(jnp.float32) * gamma_bf16.astype(jnp.float32)).astype(jnp.bfloat16)
    assert jnp.allclose(
        y_bf16.astype(jnp.float32), ref_bf16.astype(jnp.float32), rtol=2e-2, atol=1e-9
    )

    # Fallback path: D not a multiple of 128 AND row count not divisible by the
    # fold factor (masked stores, still correct).
    B3, N3, D3 = 1, 3, 48
    x_odd = jax.random.normal(jax.random.PRNGKey(2), (B3, N3, D3), dtype=jnp.float32)
    gamma_odd = init_values * jnp.ones((D3,), dtype=jnp.float32)
    y_odd = layer_scale(x_odd, gamma_odd)
    jax.block_until_ready(y_odd)
    assert jnp.allclose(y_odd, x_odd * gamma_odd, atol=1e-7, rtol=1e-6)

    print("KERNEL_OK")
</pallas_src>

<mosaic_0001>
module attributes {stable_mosaic.version = 11 : i64} {
  func.func @_layer_scale_kernel(%arg0: i32, %arg1: memref<4x128xf32, #tpu.memory_space<vmem>>, %arg2: memref<1x128xf32, #tpu.memory_space<vmem>>, %arg3: memref<4x128xf32, #tpu.memory_space<vmem>>) attributes {dimension_semantics = [#tpu.dimension_semantics<parallel>], iteration_bounds = array<i64: 1>, scalar_prefetch = 0 : i64, scratch_operands = 0 : i64, tpu.core_type = #tpu.core_type<tc>, window_params = [{transform_indices = @transform_0, window_bounds = array<i64: 4, 128>}, {pipeline_mode = #tpu.pipeline_mode<synchronous>, transform_indices = @transform_1, window_bounds = array<i64: 1, 128>}, {transform_indices = @transform_2, window_bounds = array<i64: 4, 128>}]} {
    %c0 = arith.constant 0 : index
    %c0_0 = arith.constant 0 : index
    %0 = vector.load %arg1[%c0, %c0_0] : memref<4x128xf32, #tpu.memory_space<vmem>>, vector<4x128xf32>
    %c0_1 = arith.constant 0 : index
    %c0_2 = arith.constant 0 : index
    %1 = vector.load %arg2[%c0_1, %c0_2] : memref<1x128xf32, #tpu.memory_space<vmem>>, vector<1x128xf32>
    %2 = vector.broadcast %1 : vector<1x128xf32> to vector<4x128xf32>
    %3 = arith.mulf %0, %2 : vector<4x128xf32>
    %c0_3 = arith.constant 0 : index
    %c0_4 = arith.constant 0 : index
    %4 = vector.load %arg3[%c0_3, %c0_4] : memref<4x128xf32, #tpu.memory_space<vmem>>, vector<4x128xf32>
    tpu.vector_store %arg3[%c0_3, %c0_4], %3 {strides = array<i32>} : memref<4x128xf32, #tpu.memory_space<vmem>>, vector<4x128xf32>,
    return
  }
  func.func @transform_0(%arg0: i32) -> (i32, i32) {
    %c0_i32 = arith.constant 0 : i32
    %c0_i32_0 = arith.constant 0 : i32
    return %arg0, %c0_i32 : i32, i32
  }
  func.func @transform_1(%arg0: i32) -> (i32, i32) {
    %c0_i32 = arith.constant 0 : i32
    %c0_i32_0 = arith.constant 0 : i32
    %c0_i32_1 = arith.constant 0 : i32
    return %c0_i32, %c0_i32_0 : i32, i32
  }
  func.func @transform_2(%arg0: i32) -> (i32, i32) {
    %c0_i32 = arith.constant 0 : i32
    %c0_i32_0 = arith.constant 0 : i32
    return %arg0, %c0_i32 : i32, i32
  }
}

</mosaic_0001>

<bundles_post_ra>
// kernel: tpu_custom_call.1
= control target key start
LH: loop header
LB: loop body
LE: loop exit
PB: predicated region body
PF: predicated region fallthrough
CT: control target
= control target key end

     0   :  { %7 = vsyncpa [#allocation3], 0  ;;  %s122_s0 = inlined_call_operand.hbm [shape: f32[4,128], index: 0, kind: input, shape index: {}]   ;;  %s123_s1 = inlined_call_operand.vmem [shape: f32[1,128], index: 1, kind: input, shape index: {}]   ;;  %s124_s2 = inlined_call_operand.hbm [shape: f32[4,128], index: 2, kind: output, shape index: {}]  }
   0x1   :  { %8 = vsyncpa [#allocation4], 0  ;;  %s96_s9 = smov [#allocation2]  }
   0x2   :  { %s15_s10 = sshll.u32 %s96_s9, 4  ;;  %s16_s10 = int_to_ptr.vmem [resolvable:$true] %s15_s10 }
   0x3   :  { %s60_s11 = scalar_lea.vmem %s16_s10, 64  ;;  %p65_p1 = scmp.lt.s32.totalorder %s16_s10, %s16_s10 }
   0x4   :  { %p61_p0 = scmp.ne.s32.totalorder %s16_s10, %s60_s11  ;;  %p66_p2 = scmp.lt.s32.totalorder %s60_s11, %s60_s11 }
   0x6   :  { %p67_p3 = por %p66_p2, %p65_p1 }
   0x8   :  { %p68_p4 = pnand %p67_p3, %p61_p0 }
   0xa   :  { %71 = shalt.err (!%p68_p4)
}
   0xb   :  { %18 = dma.hbm_to_vmem [thread:$0]  %s122_s0, 64, %s16_s10, [#allocation3]  }
   0xc   :  { %92 = dma.done.wait [#allocation3], 64  }
   0xd   :  { %93 = vsyncadd [#allocation3], 4294967232  ;;  %s97_s14 = smov [#allocation5]   ;;  %v24_v0 = vld [vmem:[#allocation2] sm:$0xf] }
   0xe   :  { %s40_s15 = sshll.u32 %s97_s14, 4  ;;  %v49_v1 = vld [vmem:[%s123_s1] ss:$0 sm:$0xff]  ;;  %s41_s15 = int_to_ptr.vmem [resolvable:$true] %s40_s15 }
   0xf   :  { %v32_v2 = vmul.f32 %v49_v1, %v24_v0  ;;  %s72_s18 = scalar_lea.vmem %s41_s15, 64  ;;  %p77_p6 = scmp.lt.s32.totalorder %s41_s15, %s41_s15 }
  0x10   :  { %p73_p5 = scmp.ne.s32.totalorder %s41_s15, %s72_s18  ;;  %p78_p7 = scmp.lt.s32.totalorder %s72_s18, %s72_s18 }
  0x11   :  { %33 = vst [vmem:[#allocation5] sm:$0xf] %v32_v2 }
  0x12   :  { %p79_p8 = por %p78_p7, %p77_p6 }
  0x14   :  { %p80_p9 = pnand %p79_p8, %p73_p5 }
  0x16   :  { %83 = shalt.err (!%p80_p9)
}
  0x17   :  { %43 = dma.vmem_to_hbm [thread:$0]  %s41_s15, 64, %s124_s2, [#allocation4]  }
  0x18   :  { %94 = dma.done.wait [#allocation4], 64  }
  0x19   :  { %95 = vsyncadd [#allocation4], 4294967232 }
  0x1a   :  { %47 = vsyncpa [#allocation3], 1 }
  0x1b   :  { %48 = vsyncpa [#allocation4], 1 }

</bundles_post_ra>
